<compile_context>
chip_gen: v5e
topology: v5e:2x2
jax: 0.10.0
libtpu: 0.0.40
codegen_flags: <defaults>
</compile_context>

<pallas_src>
import functools

import jax
import jax.numpy as jnp
from jax.experimental import pallas as pl
from jax.experimental.pallas import tpu as pltpu


# ---------------------------------------------------------------------------
# Pass 1: streamed global-average-pool + SE bottleneck MLP -> channel gate
# ---------------------------------------------------------------------------
def _gate_kernel(x_ref, w1_ref, b1_ref, w2_ref, b2_ref, gate_ref, acc_ref,
                 *, hw_total, needs_mask):
    # x_ref:    (1, THW, C)   streamed tile of one batch element (channels-last)
    # w1_ref:   (C, OC)       b1_ref: (1, OC)
    # w2_ref:   (OC, C)       b2_ref: (1, C)
    # gate_ref: (1, 1, C)     per-batch channel gate (f32)
    # acc_ref:  (1, C)        f32 running sum over HW (VMEM scratch)
    t = pl.program_id(1)

    @pl.when(t == 0)
    def _init():
        acc_ref[...] = jnp.zeros_like(acc_ref)

    x = x_ref[...]  # (1, THW, C), kept in its native dtype
    if needs_mask:
        # Last HW tile may run past the array; zero the out-of-range rows.
        thw = x.shape[1]
        rows_done = t * thw
        row_idx = jax.lax.broadcasted_iota(jnp.int32, x.shape, 1)
        x = jnp.where(row_idx < (hw_total - rows_done), x, jnp.zeros_like(x))

    # Accumulate the spatial sum in f32 without materializing an f32 copy of x.
    acc_ref[...] += jnp.sum(x, axis=1, dtype=jnp.float32)  # (1, C)

    @pl.when(t == pl.num_programs(1) - 1)
    def _finalize():
        pooled = acc_ref[...] * jnp.float32(1.0 / hw_total)          # (1, C)
        h = jnp.dot(pooled, w1_ref[...],
                    preferred_element_type=jnp.float32) + b1_ref[...]
        h = jnp.maximum(h, 0.0)                                      # (1, OC)
        g = jnp.dot(h, w2_ref[...],
                    preferred_element_type=jnp.float32) + b2_ref[...]
        gate_ref[...] = jax.nn.sigmoid(g)[None].astype(gate_ref.dtype)  # (1, 1, C)


# ---------------------------------------------------------------------------
# Pass 2: tiled elementwise scale (pure HBM-bandwidth bound)
# ---------------------------------------------------------------------------
def _scale_kernel(x_ref, gate_ref, o_ref):
    # x_ref: (1, THW, C)   gate_ref: (1, 1, C)   o_ref: (1, THW, C)
    g = gate_ref[...].astype(x_ref.dtype)      # broadcast along sublanes for free
    o_ref[...] = (x_ref[...] * g).astype(o_ref.dtype)


def _pick_hw_tile(hw, c, dtype_bytes, target_bytes):
    """Largest HW-tile (multiple of 8, or the full HW) with <= target_bytes per block."""
    if hw * c * dtype_bytes <= target_bytes:
        return hw
    rows = (target_bytes // max(1, c * dtype_bytes)) // 8 * 8
    rows = max(8, rows)
    return min(rows, hw)


def global_feature_enhancement(x, w1, b1, w2, b2, *,
                               tile_bytes=4 * 1024 * 1024,
                               vmem_limit_bytes=32 * 1024 * 1024):
    """x: (B, C, H, W). w1: (C, OC), b1: (OC,), w2: (OC, C), b2: (C,)."""
    B, C, H, W = x.shape
    OC = w1.shape[1]
    HW = H * W
    dtype_bytes = jnp.dtype(x.dtype).itemsize

    # Channels-last flat layout: lane axis = C. (In an NHWC pipeline these transposes
    # vanish; here they are wrapper-side layout plumbing only.)
    x_flat = jnp.transpose(x, (0, 2, 3, 1)).reshape(B, HW, C)
    b1_2d = b1.reshape(1, OC)
    b2_2d = b2.reshape(1, C)

    thw = _pick_hw_tile(HW, C, dtype_bytes, tile_bytes)
    n_hw = pl.cdiv(HW, thw)
    needs_mask = (HW % thw) != 0

    # ---- Pass 1: per-(B, C) gate ------------------------------------------------
    gate = pl.pallas_call(
        functools.partial(_gate_kernel, hw_total=HW, needs_mask=needs_mask),
        out_shape=jax.ShapeDtypeStruct((B, 1, C), jnp.float32),
        grid_spec=pltpu.PrefetchScalarGridSpec(
            num_scalar_prefetch=0,
            grid=(B, n_hw),                      # reduction (HW) axis last
            in_specs=[
                pl.BlockSpec((1, thw, C), lambda b, t: (b, t, 0)),
                pl.BlockSpec((C, OC), lambda b, t: (0, 0)),
                pl.BlockSpec((1, OC), lambda b, t: (0, 0)),
                pl.BlockSpec((OC, C), lambda b, t: (0, 0)),
                pl.BlockSpec((1, C), lambda b, t: (0, 0)),
            ],
            out_specs=pl.BlockSpec((1, 1, C), lambda b, t: (b, 0, 0)),
            scratch_shapes=[pltpu.VMEM((1, C), jnp.float32)],
        ),
        compiler_params=pltpu.CompilerParams(
            dimension_semantics=("parallel", "arbitrary"),
            vmem_limit_bytes=vmem_limit_bytes,
        ),
    )(x_flat, w1, b1_2d, w2, b2_2d)

    # ---- Pass 2: scale every tile by its batch's gate ----------------------------
    out_flat = pl.pallas_call(
        _scale_kernel,
        out_shape=jax.ShapeDtypeStruct((B, HW, C), x.dtype),
        grid_spec=pltpu.PrefetchScalarGridSpec(
            num_scalar_prefetch=0,
            grid=(B, n_hw),
            in_specs=[
                pl.BlockSpec((1, thw, C), lambda b, t: (b, t, 0)),
                pl.BlockSpec((1, 1, C), lambda b, t: (b, 0, 0)),
            ],
            out_specs=pl.BlockSpec((1, thw, C), lambda b, t: (b, t, 0)),
        ),
        compiler_params=pltpu.CompilerParams(
            dimension_semantics=("parallel", "parallel"),
            vmem_limit_bytes=vmem_limit_bytes,
        ),
    )(x_flat, gate)

    return jnp.transpose(out_flat.reshape(B, H, W, C), (0, 3, 1, 2))


def _reference(x, w1, b1, w2, b2):
    pooled = jnp.mean(x, axis=(2, 3))                      # (B, C)
    h = jnp.maximum(pooled @ w1 + b1, 0.0)                 # (B, OC)
    g = jax.nn.sigmoid(h @ w2 + b2)                        # (B, C)
    return x * g[:, :, None, None]


if __name__ == "__main__":
    B, C, H, W = 2, 4, 16, 16
    OC = 8  # hidden size of the SE bottleneck (fc1 out_channels)

    key = jax.random.PRNGKey(0)
    kx, k1, k2, k3, k4 = jax.random.split(key, 5)

    x = jax.random.normal(kx, (B, C, H, W), dtype=jnp.float32)
    # Torch stores fc.weight as (out, in); keep parameters pre-transposed as (in, out).
    w1 = jax.random.normal(k1, (C, OC), dtype=jnp.float32) * (1.0 / jnp.sqrt(C))
    b1 = jax.random.normal(k2, (OC,), dtype=jnp.float32) * 0.1
    w2 = jax.random.normal(k3, (OC, C), dtype=jnp.float32) * (1.0 / jnp.sqrt(OC))
    b2 = jax.random.normal(k4, (C,), dtype=jnp.float32) * 0.1

    out = global_feature_enhancement(x, w1, b1, w2, b2)
    out = jax.block_until_ready(out)

    ref = _reference(x, w1, b1, w2, b2)
    assert out.shape == (B, C, H, W)
    assert jnp.allclose(out, ref, atol=1e-5, rtol=1e-5), "mismatch vs reference"

    print("KERNEL_OK")
</pallas_src>

<mosaic_0001>
module attributes {stable_mosaic.version = 11 : i64} {
  func.func @_gate_kernel(%arg0: i32, %arg1: i32, %arg2: memref<1x256x4xf32, #tpu.memory_space<vmem>>, %arg3: memref<4x8xf32, #tpu.memory_space<vmem>>, %arg4: memref<1x8xf32, #tpu.memory_space<vmem>>, %arg5: memref<8x4xf32, #tpu.memory_space<vmem>>, %arg6: memref<1x4xf32, #tpu.memory_space<vmem>>, %arg7: memref<1x1x4xf32, #tpu.memory_space<vmem>>, %arg8: memref<1x4xf32, #tpu.memory_space<vmem>>) attributes {dimension_semantics = [#tpu.dimension_semantics<parallel>, #tpu.dimension_semantics<arbitrary>], iteration_bounds = array<i64: 2, 1>, scalar_prefetch = 0 : i64, scratch_operands = 1 : i64, tpu.core_type = #tpu.core_type<tc>, window_params = [{transform_indices = @transform_0, window_bounds = array<i64: 1, 256, 4>}, {pipeline_mode = #tpu.pipeline_mode<synchronous>, transform_indices = @transform_1, window_bounds = array<i64: 4, 8>}, {pipeline_mode = #tpu.pipeline_mode<synchronous>, transform_indices = @transform_2, window_bounds = array<i64: 1, 8>}, {pipeline_mode = #tpu.pipeline_mode<synchronous>, transform_indices = @transform_3, window_bounds = array<i64: 8, 4>}, {pipeline_mode = #tpu.pipeline_mode<synchronous>, transform_indices = @transform_4, window_bounds = array<i64: 1, 4>}, {transform_indices = @transform_5, window_bounds = array<i64: 1, 1, 4>}]} {
    %c0_i32 = arith.constant 0 : i32
    %0 = arith.cmpi eq, %arg1, %c0_i32 : i32
    %1 = arith.extui %0 : i1 to i32
    %c0_i32_0 = arith.constant 0 : i32
    %2 = arith.cmpi ne, %1, %c0_i32_0 : i32
    scf.if %2 {
      %cst_9 = arith.constant 0.000000e+00 : f32
      %11 = vector.broadcast %cst_9 : f32 to vector<1x4xf32>
      %c0_10 = arith.constant 0 : index
      %c0_11 = arith.constant 0 : index
      %12 = vector.load %arg8[%c0_10, %c0_11] : memref<1x4xf32, #tpu.memory_space<vmem>>, vector<1x4xf32>
      tpu.vector_store %arg8[%c0_10, %c0_11], %11 {strides = array<i32>} : memref<1x4xf32, #tpu.memory_space<vmem>>, vector<1x4xf32>,
    } else {
    }
    %c0 = arith.constant 0 : index
    %c0_1 = arith.constant 0 : index
    %c0_2 = arith.constant 0 : index
    %3 = vector.load %arg2[%c0, %c0_1, %c0_2] : memref<1x256x4xf32, #tpu.memory_space<vmem>>, vector<1x256x4xf32>
    %c0_3 = arith.constant 0 : index
    %c0_4 = arith.constant 0 : index
    %4 = vector.load %arg8[%c0_3, %c0_4] : memref<1x4xf32, #tpu.memory_space<vmem>>, vector<1x4xf32>
    %cst = arith.constant dense<0.000000e+00> : vector<1x4xf32>
    %5 = vector.multi_reduction <add>, %3, %cst [1] : vector<1x256x4xf32> to vector<1x4xf32>
    %6 = arith.addf %4, %5 : vector<1x4xf32>
    %c0_5 = arith.constant 0 : index
    %c0_6 = arith.constant 0 : index
    %7 = vector.load %arg8[%c0_5, %c0_6] : memref<1x4xf32, #tpu.memory_space<vmem>>, vector<1x4xf32>
    tpu.vector_store %arg8[%c0_5, %c0_6], %6 {strides = array<i32>} : memref<1x4xf32, #tpu.memory_space<vmem>>, vector<1x4xf32>,
    %c0_i32_7 = arith.constant 0 : i32
    %8 = arith.cmpi eq, %arg1, %c0_i32_7 : i32
    %9 = arith.extui %8 : i1 to i32
    %c0_i32_8 = arith.constant 0 : i32
    %10 = arith.cmpi ne, %9, %c0_i32_8 : i32
    scf.if %10 {
      %c0_9 = arith.constant 0 : index
      %c0_10 = arith.constant 0 : index
      %11 = vector.load %arg8[%c0_9, %c0_10] : memref<1x4xf32, #tpu.memory_space<vmem>>, vector<1x4xf32>
      %cst_11 = arith.constant 3.906250e-03 : f32
      %12 = vector.broadcast %cst_11 : f32 to vector<1x4xf32>
      %13 = arith.mulf %11, %12 : vector<1x4xf32>
      %c0_12 = arith.constant 0 : index
      %c0_13 = arith.constant 0 : index
      %14 = vector.load %arg3[%c0_12, %c0_13] : memref<4x8xf32, #tpu.memory_space<vmem>>, vector<4x8xf32>
      %cst_14 = arith.constant dense<0.000000e+00> : vector<1x8xf32>
      %15 = tpu.matmul %13, %14, %cst_14 {dimension_numbers = #tpu.dot_dimension_numbers<[1], [0], [0], [1], [0, 0, 1, 1], [], []>} : vector<1x4xf32>, vector<4x8xf32>, vector<1x8xf32> -> vector<1x8xf32>
      %c0_15 = arith.constant 0 : index
      %c0_16 = arith.constant 0 : index
      %16 = vector.load %arg4[%c0_15, %c0_16] : memref<1x8xf32, #tpu.memory_space<vmem>>, vector<1x8xf32>
      %17 = arith.addf %15, %16 : vector<1x8xf32>
      %cst_17 = arith.constant 0.000000e+00 : f32
      %18 = vector.broadcast %cst_17 : f32 to vector<1x8xf32>
      %19 = arith.maximumf %17, %18 : vector<1x8xf32>
      %c0_18 = arith.constant 0 : index
      %c0_19 = arith.constant 0 : index
      %20 = vector.load %arg5[%c0_18, %c0_19] : memref<8x4xf32, #tpu.memory_space<vmem>>, vector<8x4xf32>
      %cst_20 = arith.constant dense<0.000000e+00> : vector<1x4xf32>
      %21 = tpu.matmul %19, %20, %cst_20 {dimension_numbers = #tpu.dot_dimension_numbers<[1], [0], [0], [1], [0, 0, 1, 1], [], []>} : vector<1x8xf32>, vector<8x4xf32>, vector<1x4xf32> -> vector<1x4xf32>
      %c0_21 = arith.constant 0 : index
      %c0_22 = arith.constant 0 : index
      %22 = vector.load %arg6[%c0_21, %c0_22] : memref<1x4xf32, #tpu.memory_space<vmem>>, vector<1x4xf32>
      %23 = arith.addf %21, %22 : vector<1x4xf32>
      %24 = arith.negf %23 : vector<1x4xf32>
      %25 = math.exp %24 : vector<1x4xf32>
      %cst_23 = arith.constant 1.000000e+00 : f32
      %26 = vector.broadcast %cst_23 : f32 to vector<1x4xf32>
      %27 = arith.addf %26, %25 : vector<1x4xf32>
      %28 = arith.divf %26, %27 : vector<1x4xf32>
      %29 = vector.shape_cast %28 : vector<1x4xf32> to vector<1x1x4xf32>
      %c0_24 = arith.constant 0 : index
      %c0_25 = arith.constant 0 : index
      %c0_26 = arith.constant 0 : index
      %30 = vector.load %arg7[%c0_24, %c0_25, %c0_26] : memref<1x1x4xf32, #tpu.memory_space<vmem>>, vector<1x1x4xf32>
      tpu.vector_store %arg7[%c0_24, %c0_25, %c0_26], %29 {strides = array<i32>} : memref<1x1x4xf32, #tpu.memory_space<vmem>>, vector<1x1x4xf32>,
    } else {
    }
    return
  }
  func.func @transform_0(%arg0: i32, %arg1: i32) -> (i32, i32, i32) {
    %c0_i32 = arith.constant 0 : i32
    %c0_i32_0 = arith.constant 0 : i32
    return %arg0, %arg1, %c0_i32 : i32, i32, i32
  }
  func.func @transform_1(%arg0: i32, %arg1: i32) -> (i32, i32) {
    %c0_i32 = arith.constant 0 : i32
    %c0_i32_0 = arith.constant 0 : i32
    %c0_i32_1 = arith.constant 0 : i32
    return %c0_i32, %c0_i32_0 : i32, i32
  }
  func.func @transform_2(%arg0: i32, %arg1: i32) -> (i32, i32) {
    %c0_i32 = arith.constant 0 : i32
    %c0_i32_0 = arith.constant 0 : i32
    %c0_i32_1 = arith.constant 0 : i32
    return %c0_i32, %c0_i32_0 : i32, i32
  }
  func.func @transform_3(%arg0: i32, %arg1: i32) -> (i32, i32) {
    %c0_i32 = arith.constant 0 : i32
    %c0_i32_0 = arith.constant 0 : i32
    %c0_i32_1 = arith.constant 0 : i32
    return %c0_i32, %c0_i32_0 : i32, i32
  }
  func.func @transform_4(%arg0: i32, %arg1: i32) -> (i32, i32) {
    %c0_i32 = arith.constant 0 : i32
    %c0_i32_0 = arith.constant 0 : i32
    %c0_i32_1 = arith.constant 0 : i32
    return %c0_i32, %c0_i32_0 : i32, i32
  }
  func.func @transform_5(%arg0: i32, %arg1: i32) -> (i32, i32, i32) {
    %c0_i32 = arith.constant 0 : i32
    %c0_i32_0 = arith.constant 0 : i32
    %c0_i32_1 = arith.constant 0 : i32
    return %arg0, %c0_i32, %c0_i32_0 : i32, i32, i32
  }
}

</mosaic_0001>

<bundles_post_ra>
// kernel: tpu_custom_call.1
= control target key start
LH: loop header
LB: loop body
LE: loop exit
PB: predicated region body
PF: predicated region fallthrough
CT: control target
= control target key end

     0   :  { %10 = vsyncpa [#allocation4], 0  ;;  %s889_s0 = inlined_call_operand.vmem [shape: f32[2,256,4], index: 0, kind: input, shape index: {}]   ;;  %s890_s1 = inlined_call_operand.vmem [shape: f32[4,8], index: 1, kind: input, shape index: {}]   ;;  %s891_s2 = inlined_call_operand.vmem [shape: f32[1,8], index: 2, kind: input, shape index: {}]   ;;  %s892_s3 = inlined_call_operand.vmem [shape: f32[8,4], index: 3, kind: input, shape index: {}]   ;;  %s893_s4 = inlined_call_operand.vmem [shape: f32[1,4], index: 4, kind: input, shape index: {}]   ;;  %s894_s5 = inlined_call_operand.hbm [shape: f32[2,1,4], index: 5, kind: output, shape index: {}]  }
   0x1   :  { %12 = vsyncpa [#allocation4 + $0x1], 0  ;;  %s710_s18 = smov 0   ;;  %s712_s19 = smov 0  }
   0x2   :  { %s714_s20 = smov 0   ;;  %s716_s21 = smov 0  }
   0x3   :  { %s718_s22 = smov 0   ;;  %s720_s23 = smov 0  }
   0x4 LB: > { %s525_s24 = sadd.s32 4294967295, %s677_s23   ;;  %s526_s25 = sadd.s32 4294967294, %s677_s23   ;;  %s677_s23 = sphi %s720_s23, %s18_s23   ;;  %s673_s22 = sphi %s718_s22, %s901_s22   ;;  %s669_s21 = sphi %s716_s21, %s900_s21   ;;  %s665_s20 = sphi %s714_s20, %s899_s20   ;;  %s661_s19 = sphi %s712_s19, %s898_s19   ;;  %s657_s18 = sphi %s710_s18, %s897_s18  }
   0x5   : > { %s30_s26 = sadd.s32 1, %s673_s22  ;;  %s149_s27 = sadd.s32 1, %s665_s20 }
   0x6   : > { %p32_p0 = scmp.ge.s32.totalorder %s30_s26, 2  ;;  %p159_p1 = scmp.ne.s32.totalorder %s665_s20, %s661_s19 }
   0x7   : > { %p160_p2 = scmp.eq.s32.totalorder %s525_s24, 1  ;;  %p165_p3 = scmp.ne.s32.totalorder %s661_s19, %s657_s18 }
   0x8   : > { %s903_s26 = smov (%p32_p0, %s30_s26), 0  ;;  %p166_p5 = scmp.eq.s32.totalorder %s526_s25, 1 }
   0x9   : > { %p750_p4 = por %p160_p2, %p159_p1  ;;  %s146_s29 = ssub.s32 %s673_s22, %s903_s26 }
   0xa   : > { %p529_p6 = scmp.ge.s32.totalorder %s677_s23, 1  ;;  %p147_p7 = scmp.eq.s32.totalorder %s146_s29, 0 }
   0xb   : > { %p757_p8 = por %p166_p5, %p165_p3  ;;  %p209_p9 = scmp.lt.s32.totalorder %s677_s23, 3 }
   0xc   : > { %s763_s6 = scalar_select %p147_p7, %s665_s20, %s149_s27  }
   0xd   : > { %p210_p10 = pnand %p529_p6, %p209_p9 }
   0xe   : > { %p241_p11 = scmp.lt.s32.totalorder (!%p210_p10), %s669_s21, 1  ;;  %s238_s27 = sand.u32 (!%p210_p10), 1, %s661_s19  }
   0xf   : > { %213 = sbr.rel (%p210_p10) target bundleno = 401 (0x191), region = 40  ;;  %s452_s8 = scalar_lea.hbm (!%p210_p10), %s894_s5, %s669_s21 }
  0x10   : > { %s456_s11 = sshll.u32 (!%p210_p10), %s452_s8, 4  ;;  %s619_s16 = scalar_lea.hbm (!%p210_p10), %s894_s5, 2  ;;  %s457_s11 = int_to_ptr.hbm [resolvable:$true] %s456_s11 }
  0x11   : > { %s613_s12 = sshra.s32 (!%p210_p10), %s457_s11, 4  ;;  %s614_s12 = int_to_ptr.hbm [resolvable:$true] %s613_s12 }
  0x12   : > { %p620_p1 = scmp.lt.s32.totalorder (!%p210_p10), %s614_s12, %s894_s5 }
  0x14   : > { %v367_v0 = vld [vmem:[%s890_s1] sm:$0xf]  ;;  %vm372_vm0 = vcmask 1043456   ;;  %vm254_vm1 = vcmask 24576   ;;  %v679_v1 = vmov 0.0   ;;  %s242_s9 = scalar_select %p241_p11, %s669_s21, 1 }
  0x15   : > { %532 = vmatpush.msk.msra.mxu0 %vm372_vm0, %v367_v0  ;;  %255 = vst.msk [vmem:[#allocation2] sm:$0x1] %vm254_vm1, %v679_v1  ;;  %vm289_vm2 = vcmask 31744   ;;  %vm399_vm3 = vcmask 64512   ;;  %s444_s21 = scalar_lea.sflag [#allocation4], %s238_s27 }
  0x16   : > { %s538_s10 = sshll.u32 %s242_s9, 8  ;;  %s239_s9 = scalar_lea.vmem [#allocation3], %s238_s27 }
  0x17   : > { %s774_s13 = scalar_lea.vmem %s889_s0, %s538_s10  ;;  %s454_s10 = sshll.u32 %s239_s9, 4  ;;  %s455_s10 = int_to_ptr.vmem [resolvable:$true] %s454_s10 }
  0x18   : > { %v256_v2 = vld [vmem:[%s774_s13] sm:$0xff]  ;;  %v257_v3 = vld [vmem:[%s774_s13 + $0x8] sm:$0xff]  ;;  %v258_v4 = vld [vmem:[%s774_s13 + $0x10] sm:$0xff] }
  0x19   : > { %v259_v5 = vld [vmem:[%s774_s13 + $0x18] sm:$0xff]  ;;  %v290_v6 = vsel %vm289_vm2, %v256_v2, 0.0  ;;  %v291_v7 = vsel %vm289_vm2, %v257_v3, 0.0  ;;  %v293_v8 = vsel %vm289_vm2, %v258_v4, 0.0  ;;  %v260_v9 = vld [vmem:[%s774_s13 + $0x20] sm:$0xff]  ;;  %v261_v12 = vld [vmem:[%s774_s13 + $0x28] sm:$0xff] }
  0x1a   : > { %v292_v10 = vadd.f32 %v291_v7, %v290_v6  ;;  %v295_v11 = vsel %vm289_vm2, %v259_v5, 0.0  ;;  %v297_v14 = vsel %vm289_vm2, %v260_v9, 0.0  ;;  %v262_v15 = vld [vmem:[%s774_s13 + $0x30] sm:$0xff]  ;;  %v299_v17 = vsel %vm289_vm2, %v261_v12, 0.0  ;;  %v263_v18 = vld [vmem:[%s774_s13 + $0x38] sm:$0xff]  ;;  %v264_v21 = vld [vmem:[%s774_s13 + $0x40] sm:$0xff] }
  0x1b   : > { %v301_v20 = vsel %vm289_vm2, %v262_v15, 0.0  ;;  %v303_v23 = vsel %vm289_vm2, %v263_v18, 0.0  ;;  %v265_v24 = vld [vmem:[%s774_s13 + $0x48] sm:$0xff]  ;;  %v305_v26 = vsel %vm289_vm2, %v264_v21, 0.0  ;;  %v266_v27 = vld [vmem:[%s774_s13 + $0x50] sm:$0xff]  ;;  %v267_v30 = vld [vmem:[%s774_s13 + $0x58] sm:$0xff] }
  0x1c   : > { %v294_v13 = vadd.f32 %v293_v8, %v292_v10  ;;  %v307_v29 = vsel %vm289_vm2, %v265_v24, 0.0  ;;  %v309_v32 = vsel %vm289_vm2, %v266_v27, 0.0  ;;  %v268_v33 = vld [vmem:[%s774_s13 + $0x60] sm:$0xff]  ;;  %v311_v35 = vsel %vm289_vm2, %v267_v30, 0.0  ;;  %v269_v36 = vld [vmem:[%s774_s13 + $0x68] sm:$0xff]  ;;  %v270_v39 = vld [vmem:[%s774_s13 + $0x70] sm:$0xff] }
  0x1d   : > { %v313_v38 = vsel %vm289_vm2, %v268_v33, 0.0  ;;  %v315_v41 = vsel %vm289_vm2, %v269_v36, 0.0  ;;  %v271_v42 = vld [vmem:[%s774_s13 + $0x78] sm:$0xff]  ;;  %v317_v44 = vsel %vm289_vm2, %v270_v39, 0.0  ;;  %v272_v45 = vld [vmem:[%s774_s13 + $0x80] sm:$0xff]  ;;  %v273_v48 = vld [vmem:[%s774_s13 + $0x88] sm:$0xff] }
  0x1e   : > { %v296_v16 = vadd.f32 %v295_v11, %v294_v13  ;;  %v319_v47 = vsel %vm289_vm2, %v271_v42, 0.0  ;;  %v321_v50 = vsel %vm289_vm2, %v272_v45, 0.0  ;;  %v274_v51 = vld [vmem:[%s774_s13 + $0x90] sm:$0xff]  ;;  %v323_v53 = vsel %vm289_vm2, %v273_v48, 0.0  ;;  %v275_v54 = vld [vmem:[%s774_s13 + $0x98] sm:$0xff]  ;;  %v276_v57 = vld [vmem:[%s774_s13 + $0xa0] sm:$0xff] }
  0x1f   : > { %v325_v56 = vsel %vm289_vm2, %v274_v51, 0.0  ;;  %v327_v59 = vsel %vm289_vm2, %v275_v54, 0.0  ;;  %v277_v60 = vld [vmem:[%s774_s13 + $0xa8] sm:$0xff]  ;;  %v329_v62 = vsel %vm289_vm2, %v276_v57, 0.0  ;;  %v278_v63 = vld [vmem:[%s774_s13 + $0xb0] sm:$0xff]  ;;  %v279_v2 = vld [vmem:[%s774_s13 + $0xb8] sm:$0xff] }
  0x20   : > { %v298_v19 = vadd.f32 %v297_v14, %v296_v16  ;;  %v331_v1 = vsel %vm289_vm2, %v277_v60, 0.0  ;;  %v333_v4 = vsel %vm289_vm2, %v278_v63, 0.0  ;;  %v280_v5 = vld [vmem:[%s774_s13 + $0xc0] sm:$0xff]  ;;  %v335_v7 = vsel %vm289_vm2, %v279_v2, 0.0  ;;  %v281_v8 = vld [vmem:[%s774_s13 + $0xc8] sm:$0xff]  ;;  %v282_v11 = vld [vmem:[%s774_s13 + $0xd0] sm:$0xff] }
  0x21   : > { %v337_v10 = vsel %vm289_vm2, %v280_v5, 0.0  ;;  %v339_v13 = vsel %vm289_vm2, %v281_v8, 0.0  ;;  %v283_v14 = vld [vmem:[%s774_s13 + $0xd8] sm:$0xff]  ;;  %v341_v16 = vsel %vm289_vm2, %v282_v11, 0.0  ;;  %v398_v48 = vld [vmem:[%s893_s4] sm:$0x1] }
  0x22   : > { %v300_v22 = vadd.f32 %v299_v17, %v298_v19  ;;  %v284_v17 = vld [vmem:[%s774_s13 + $0xe0] sm:$0xff]  ;;  %v343_v19 = vsel %vm289_vm2, %v283_v14, 0.0 }
  0x24   : > { %v302_v25 = vadd.f32 %v301_v20, %v300_v22  ;;  %v285_v20 = vld [vmem:[%s774_s13 + $0xe8] sm:$0xff]  ;;  %v345_v22 = vsel %vm289_vm2, %v284_v17, 0.0 }
  0x26   : > { %v304_v28 = vadd.f32 %v303_v23, %v302_v25  ;;  %v286_v23 = vld [vmem:[%s774_s13 + $0xf0] sm:$0xff]  ;;  %v347_v25 = vsel %vm289_vm2, %v285_v20, 0.0 }
  0x28   : > { %v306_v31 = vadd.f32 %v305_v26, %v304_v28  ;;  %v287_v26 = vld [vmem:[%s774_s13 + $0xf8] sm:$0xff]  ;;  %v349_v28 = vsel %vm289_vm2, %v286_v23, 0.0  ;;  %s615_s13 = scalar_lea.hbm %s614_s12, 1 }
  0x29   : > { %v351_v30 = vsel %vm289_vm2, %v287_v26, 0.0  ;;  %p616_p12 = scmp.ne.s32.totalorder %s614_s12, %s615_s13  ;;  %p621_p2 = scmp.lt.s32.totalorder %s619_s16, %s615_s13 }
  0x2a   : > { %v308_v34 = vadd.f32 %v307_v29, %v306_v31 }
  0x2b   : > { %p617_p13 = pnand %p616_p12, %p750_p4  ;;  %p622_p3 = por %p621_p2, %p620_p1 }
  0x2c   : > { %v310_v37 = vadd.f32 %v309_v32, %v308_v34 }
  0x2d   : > { %p618_p0 = pneg %p617_p13 }
  0x2e   : > { %v312_v40 = vadd.f32 %v311_v35, %v310_v37 }
  0x2f   : > { %p623_p5 = pnand %p622_p3, %p618_p0 }
  0x30   : > { %v314_v43 = vadd.f32 %v313_v38, %v312_v40  ;;  %v288_v38 = vld [vmem:[#allocation2] sm:$0x1] }
  0x32   : > { %v316_v46 = vadd.f32 %v315_v41, %v314_v43  ;;  %v397_v43 = vld [vmem:[%s892_s3] sm:$0xff] }
  0x33   : > { %418 = vmatpush.msra.mxu1 %v397_v43 }
  0x34   : > { %v318_v49 = vadd.f32 %v317_v44, %v316_v46  ;;  %v368_v44 = vld [vmem:[%s891_s2] sm:$0x1] }
  0x36   : > { %v320_v52 = vadd.f32 %v319_v47, %v318_v49 }
  0x38   : > { %v322_v55 = vadd.f32 %v321_v50, %v320_v52 }
  0x3a   : > { %v324_v58 = vadd.f32 %v323_v53, %v322_v55 }
  0x3c   : > { %v326_v61 = vadd.f32 %v325_v56, %v324_v58 }
  0x3e   : > { %v328_v0 = vadd.f32 %v327_v59, %v326_v61 }
  0x40   : > { %v330_v3 = vadd.f32 %v329_v62, %v328_v0 }
  0x42   : > { %v332_v6 = vadd.f32 %v331_v1, %v330_v3 }
  0x44   : > { %v334_v9 = vadd.f32 %v333_v4, %v332_v6 }
  0x46   : > { %v336_v12 = vadd.f32 %v335_v7, %v334_v9 }
  0x48   : > { %v338_v15 = vadd.f32 %v337_v10, %v336_v12 }
  0x4a   : > { %v340_v18 = vadd.f32 %v339_v13, %v338_v15 }
  0x4c   : > { %v342_v21 = vadd.f32 %v341_v16, %v340_v18 }
  0x4e   : > { %v344_v24 = vadd.f32 %v343_v19, %v342_v21 }
  0x50   : > { %v346_v27 = vadd.f32 %v345_v22, %v344_v24 }
  0x52   : > { %v348_v29 = vadd.f32 %v347_v25, %v346_v27 }
  0x54   : > { %v350_v31 = vadd.f32 %v349_v28, %v348_v29 }
  0x56   : > { %v352_v32 = vadd.f32 %v351_v30, %v350_v31 }
  0x58   : > { %v353_v33 = vrot.slane %v352_v32, 4 }
  0x5a   : > { %v354_v34 = vadd.f32 %v353_v33, %v352_v32 }
  0x5c   : > { %v355_v35 = vrot.slane %v354_v34, 2 }
  0x5e   : > { %v356_v36 = vadd.f32 %v355_v35, %v354_v34 }
  0x60   : > { %v357_v37 = vrot.slane %v356_v36, 1 }
  0x62   : > { %v358_v39 = vadd.f32 %v357_v37, %v356_v36 }
  0x64   : > { %v359_v40 = vadd.f32 %v358_v39, %v288_v38 }
  0x66   : > { %361 = vst.msk [vmem:[#allocation2] sm:$0x1] %vm254_vm1, %v359_v40 }
  0x6d   : > { %v365_v41 = vld [vmem:[#allocation2] sm:$0x1] }
  0x6e   : > { %v366_v42 = vmul.f32 0.00390625, %v365_v41 }
  0x70   : > { %533 = vmatmul.msk.f32.vlgmr.msra.gmra.mxu0 %vm289_vm2, %v366_v42 }
  0xed   : > { %v393_v45 = vpop.f32.mrf.mxu0 }
  0xee   : > { %v394_v46 = vadd.f32 %v393_v45, %v368_v44 }
  0xf0   : > { %v396_v47 = vmax.f32 %v394_v46, 0.0 }
  0xf2   : > { %534 = vmatmul.msk.f32.vlgmr.msra.gmra.mxu1 %vm399_vm3, %v396_v47 }
 0x16f   : > { %v420_v49 = vpop.f32.mrf.mxu1 }
 0x170   : > { %v421_v50 = vadd.f32 %v420_v49, %v398_v48 }
 0x172   : > { %v535_v51 = vmul.f32 -1.442695, %v421_v50 }
 0x174   : > { %595 = vpow2.f32 %v535_v51 }
 0x17a   : > { %v596_v52 = vpop.eup %595 }
 0x17b   : > { %v426_v53 = vadd.f32 1.0, %v596_v52 }
 0x17d   : > { %597 = vrcp.f32 %v426_v53  ;;  %v438_v57 = vand.u32 2147483648, %v426_v53  ;;  %v436_v59 = vand.u32 2147483647, %v426_v53  ;;  %vm432_vm5 = vweird.f32 %v426_v53 }
 0x17f   : > { %v439_v61 = vor.u32 1.1754944e-38, %v438_v57  ;;  %vm437_vm7 = vcmp.eq.f32.partialorder %v436_v59, 8.507059e+37 }
 0x183   : > { %v598_v54 = vpop.eup %597 }
 0x184   : > { %v428_v55 = vmul.f32 %v598_v54, %v426_v53  ;;  %vm433_vm4 = vweird.f32 %v598_v54 }
 0x185   : > { %vm434_vm6 = vmor %vm432_vm5, %vm433_vm4 }
 0x186   : > { %v429_v56 = vsub.f32 1.0, %v428_v55 }
 0x188   : > { %v430_v58 = vmul.f32 %v598_v54, %v429_v56 }
 0x18a   : > { %v431_v60 = vadd.f32 %v598_v54, %v430_v58 }
 0x18c   : > { %v435_v62 = vsel %vm434_vm6, %v598_v54, %v431_v60 }
 0x18d   : > { %v440_v63 = vsel %vm437_vm7, %v439_v61, %v435_v62 }
 0x18e   : > { %442 = vst.msk [vmem:[%s239_s9] sm:$0x1] %vm254_vm1, %v440_v63 }
 0x18f   : > { %626 = shalt.err (!%p623_p5)
}
 0x190   : > { %539 = dma.vmem_to_hbm [thread:$0]  (%p750_p4), %s455_s10, 16, %s457_s11, %s444_s21  }
 0x191 PF: > { %p545_p6 = scmp.ge.s32.totalorder %s677_s23, 2  ;;  %s468_s25 = sand.u32 1, %s657_s18  }
 0x192   : > { %s469_s27 = scalar_lea.sflag [#allocation4], %s468_s25 }
 0x193   : > { %p542_p7 = pnand %p545_p6, %p757_p8 }
 0x195   : > { %p543_p9 = pneg %p542_p7 }
 0x197   : > { %652 = dma.done.wait (%p543_p9), %s469_s27, 16  }
 0x198   : > { %654 = vsyncadd (%p543_p9), %s469_s27, 4294967280  ;;  %s18_s23 = sadd.s32 1, %s677_s23   ;;  %s897_s18 = smov %s661_s19 }
 0x199   : > { %p15_p10 = scmp.ge.s32.totalorder %s18_s23, 4   ;;  %s898_s19 = smov %s665_s20 }
 0x19a   : > { %s899_s20 = smov %s763_s6  ;;  %s900_s21 = smov %s673_s22 }
 0x19b   : > { %s901_s22 = smov %s903_s26  ;;  %17 = sbr.rel (!%p15_p10) target bundleno = 4 (0x4), region = 83 }
 0x1a0   :  { %474 = vsyncpa [#allocation4], 1 }
 0x1a1   :  { %476 = vsyncpa [#allocation4 + $0x1], 1 }

</bundles_post_ra>
